<compile_context>
chip_gen: v7x
topology: tpu7x:2x2x1
jax: 0.10.0
libtpu: 0.0.40
codegen_flags: <defaults>
</compile_context>

<pallas_src>
import functools
import math

import jax
import jax.numpy as jnp
from jax.experimental import pallas as pl
from jax.experimental.pallas import tpu as pltpu


def _round_up(x, m):
    return (x + m - 1) // m * m


# ----------------------------------------------------------------------------
# Kernel 1: LayerNorm over the last dim, tiled over rows (M = B*N).
# ----------------------------------------------------------------------------
def _layernorm_kernel(x_ref, g_ref, b_ref, o_ref, *, eps):
    x = x_ref[...].astype(jnp.float32)
    mean = jnp.mean(x, axis=-1, keepdims=True)
    xc = x - mean
    var = jnp.mean(xc * xc, axis=-1, keepdims=True)
    y = xc * jax.lax.rsqrt(var + eps)
    y = y * g_ref[...].astype(jnp.float32) + b_ref[...].astype(jnp.float32)
    o_ref[...] = y.astype(o_ref.dtype)


def layernorm_pallas(x2d, gamma, beta, *, eps=1e-5, tile_m=512):
    M, D = x2d.shape
    tm = min(tile_m, _round_up(M, 8))
    Mp = _round_up(M, tm)
    if Mp != M:
        x2d = jnp.pad(x2d, ((0, Mp - M), (0, 0)))
    g2d = gamma.reshape(1, D)
    b2d = beta.reshape(1, D)
    out = pl.pallas_call(
        functools.partial(_layernorm_kernel, eps=eps),
        grid=(Mp // tm,),
        in_specs=[pl.BlockSpec((tm, D), lambda i: (i, 0)),
                  pl.BlockSpec((1, D), lambda i: (0, 0)),
                  pl.BlockSpec((1, D), lambda i: (0, 0))],
        out_specs=pl.BlockSpec((tm, D), lambda i: (i, 0)),
        out_shape=jax.ShapeDtypeStruct((Mp, D), x2d.dtype),
        compiler_params=pltpu.CompilerParams(dimension_semantics=("parallel",)),
    )(x2d, g2d, b2d)
    return out[:M]


# ----------------------------------------------------------------------------
# Kernel 2: Linear (x @ W), tiled over M / N / K.  K is the "arbitrary"
# reduction axis with a resident f32 accumulator in VMEM.
# ----------------------------------------------------------------------------
def _matmul_kernel(x_ref, w_ref, o_ref, acc_ref):
    @pl.when(pl.program_id(2) == 0)
    def _():
        acc_ref[...] = jnp.zeros_like(acc_ref)

    acc_ref[...] += jnp.dot(x_ref[...], w_ref[...],
                            preferred_element_type=jnp.float32)

    @pl.when(pl.program_id(2) == pl.num_programs(2) - 1)
    def _():
        o_ref[...] = acc_ref[...].astype(o_ref.dtype)


def linear_pallas(x2d, w_t, *, tile_m=256, tile_n=256, tile_k=512):
    """x2d: (M, K); w_t: (K, N) (already transposed from the torch (out, in))."""
    M, K = x2d.shape
    K2, N = w_t.shape
    assert K == K2
    tm = min(tile_m, _round_up(M, 8))
    tn = min(tile_n, _round_up(N, 128))
    tk = min(tile_k, _round_up(K, 128))
    Mp, Np, Kp = _round_up(M, tm), _round_up(N, tn), _round_up(K, tk)
    if (Mp, Kp) != (M, K):
        x2d = jnp.pad(x2d, ((0, Mp - M), (0, Kp - K)))
    if (Kp, Np) != (K, N):
        w_t = jnp.pad(w_t, ((0, Kp - K), (0, Np - N)))
    cost = pl.CostEstimate(
        flops=2 * Mp * Kp * Np,
        transcendentals=0,
        bytes_accessed=int((Mp * Kp + Kp * Np + Mp * Np) * x2d.dtype.itemsize),
    )
    out = pl.pallas_call(
        _matmul_kernel,
        grid=(Mp // tm, Np // tn, Kp // tk),
        in_specs=[pl.BlockSpec((tm, tk), lambda i, j, k: (i, k)),
                  pl.BlockSpec((tk, tn), lambda i, j, k: (k, j))],
        out_specs=pl.BlockSpec((tm, tn), lambda i, j, k: (i, j)),
        out_shape=jax.ShapeDtypeStruct((Mp, Np), x2d.dtype),
        scratch_shapes=[pltpu.VMEM((tm, tn), jnp.float32)],
        compiler_params=pltpu.CompilerParams(
            dimension_semantics=("parallel", "parallel", "arbitrary")),
        cost_estimate=cost,
    )(x2d, w_t)
    return out[:M, :N]


# ----------------------------------------------------------------------------
# Kernel 3: flash attention with heads folded in the lane dimension.
# Grid: (B, Nq/tq, Nk/tk); kv axis last ("arbitrary") with VMEM accumulators.
# ----------------------------------------------------------------------------
def _flash_body(q_ref, k_ref, v_ref, o_ref, m_sc, l_sc, acc_sc, *,
                scale, causal, n_head, d_head, tq, tk):
    kv = pl.program_id(2)

    @pl.when(kv == 0)
    def _():
        m_sc[...] = jnp.full(m_sc.shape, -jnp.inf, dtype=m_sc.dtype)
        l_sc[...] = jnp.zeros_like(l_sc)
        acc_sc[...] = jnp.zeros_like(acc_sc)

    q = q_ref[0].astype(jnp.float32) * scale      # (tq, H*Dh), pre-scaled
    k = k_ref[0].astype(jnp.float32)              # (tk, H*Dh)
    v = v_ref[0]                                  # (tk, H*Dh)

    if causal:                                    # static Python flag
        q_off = pl.program_id(1) * tq
        k_off = kv * tk
        row = jax.lax.broadcasted_iota(jnp.int32, (tq, tk), 0) + q_off
        col = jax.lax.broadcasted_iota(jnp.int32, (tq, tk), 1) + k_off
        keep = row >= col

    for h in range(n_head):                       # static unroll over heads
        sl = slice(h * d_head, (h + 1) * d_head)
        s = jax.lax.dot_general(q[:, sl], k[:, sl], (((1,), (1,)), ((), ())),
                                preferred_element_type=jnp.float32)  # (tq, tk)
        if causal:
            s = jnp.where(keep, s, -jnp.inf)
        m_prev = m_sc[:, h:h + 1]
        l_prev = l_sc[:, h:h + 1]
        m_new = jnp.maximum(m_prev, s.max(axis=-1, keepdims=True))
        alpha = jnp.exp(m_prev - m_new)
        p = jnp.exp(s - m_new)
        l_sc[:, h:h + 1] = alpha * l_prev + p.sum(axis=-1, keepdims=True)
        acc_sc[:, sl] = alpha * acc_sc[:, sl] + jnp.dot(
            p.astype(v.dtype), v[:, sl], preferred_element_type=jnp.float32)
        m_sc[:, h:h + 1] = m_new

    @pl.when(kv == pl.num_programs(2) - 1)
    def _():
        acc = acc_sc[...]
        l = l_sc[...]
        cols = [acc[:, h * d_head:(h + 1) * d_head] / l[:, h:h + 1]
                for h in range(n_head)]
        # single lane-dense (tq, H*Dh) store
        o_ref[0] = jnp.concatenate(cols, axis=-1).astype(o_ref.dtype)


def _flash_kernel_qkv(q_ref, k_ref, v_ref, o_ref, m_sc, l_sc, acc_sc, **kw):
    _flash_body(q_ref, k_ref, v_ref, o_ref, m_sc, l_sc, acc_sc, **kw)


def _flash_kernel_shared_kv(q_ref, kv_ref, o_ref, m_sc, l_sc, acc_sc, **kw):
    # self-attention with Identity adapter: K and V tiles are the same block
    _flash_body(q_ref, kv_ref, kv_ref, o_ref, m_sc, l_sc, acc_sc, **kw)


def flash_attention_pallas(q, k, v, *, scale, n_head, d_head, causal=False,
                           tile_q=128, tile_k=128):
    """q: (B, Nq, H*Dh); k, v: (B, Nk, H*Dh). Returns (B, Nq, H*Dh).

    Heads stay folded in the lane dim -> lane-dense blocks, no HBM transposes.
    """
    B, Nq, inner = q.shape
    _, Nk, _ = k.shape
    assert inner == n_head * d_head
    tq = min(tile_q, Nq)
    tk = min(tile_k, Nk)
    # TODO(synk): ragged / non-tile-multiple sequence lengths need a pad+mask
    # path; the demo shapes tile evenly.
    assert Nq % tq == 0 and Nk % tk == 0, "sequence length must tile evenly"
    # TODO(synk): external boolean/float attn_mask and dropout_p > 0 are not
    # implemented (the demo matches the module defaults: mask=None, dropout=0).

    shared_kv = k is v

    q_spec = pl.BlockSpec((1, tq, inner), lambda b, qi, ki: (b, qi, 0))
    kv_spec = pl.BlockSpec((1, tk, inner), lambda b, qi, ki: (b, ki, 0))
    o_spec = pl.BlockSpec((1, tq, inner), lambda b, qi, ki: (b, qi, 0))

    kw = dict(scale=scale, causal=causal, n_head=n_head, d_head=d_head,
              tq=tq, tk=tk)
    if shared_kv:
        kernel = functools.partial(_flash_kernel_shared_kv, **kw)
        operands, in_specs = (q, k), [q_spec, kv_spec]
        in_bytes = q.size + k.size
    else:
        kernel = functools.partial(_flash_kernel_qkv, **kw)
        operands, in_specs = (q, k, v), [q_spec, kv_spec, kv_spec]
        in_bytes = q.size + k.size + v.size

    cost = pl.CostEstimate(
        flops=4 * B * n_head * Nq * Nk * d_head,
        transcendentals=B * n_head * Nq * Nk,
        bytes_accessed=int((in_bytes + q.size) * q.dtype.itemsize),
    )
    return pl.pallas_call(
        kernel,
        grid=(B, Nq // tq, Nk // tk),
        in_specs=in_specs,
        out_specs=o_spec,
        out_shape=jax.ShapeDtypeStruct((B, Nq, inner), q.dtype),
        scratch_shapes=[pltpu.VMEM((tq, n_head), jnp.float32),   # running max
                        pltpu.VMEM((tq, n_head), jnp.float32),   # running sum
                        pltpu.VMEM((tq, inner), jnp.float32)],   # acc (all heads)
        compiler_params=pltpu.CompilerParams(
            dimension_semantics=("parallel", "parallel", "arbitrary")),
        cost_estimate=cost,
    )(*operands)


# ----------------------------------------------------------------------------
# Wrapper reproducing Attention.forward semantics.
# ----------------------------------------------------------------------------
def attention_forward(qry, key=None, val=None, *, params, n_head, d_head,
                      scale=None, causal=False):
    """params: ln_gamma, ln_beta, wq_t/wk_t/wv_t (None == nn.Identity), w_out_t
    (None == nn.Identity). Weights stored (in_dim, out_dim)."""
    inner = n_head * d_head
    # NOTE: reproduces the original module's operator precedence:
    #   scale = n_head * (d_head ** -0.5)
    scale = n_head * d_head ** (-0.5) if scale is None else scale

    B, Nq, D = qry.shape
    assert D == inner, "nn.LayerNorm(n_head*d_head) requires d_inp == n_head*d_head"

    # embed = nn.Identity(); norm = nn.LayerNorm(inner)
    x2d = layernorm_pallas(qry.reshape(B * Nq, D),
                           params["ln_gamma"], params["ln_beta"])
    qry_n = x2d.reshape(B, Nq, D)

    key = qry_n if key is None else key
    val = key if val is None else val

    def project(x, w_t):
        # Adapter branch: nn.Identity (dim == inner) -> skip matmul entirely.
        if w_t is None:
            return x
        b, n, c = x.shape
        return linear_pallas(x.reshape(b * n, c), w_t).reshape(b, n, inner)

    q = project(qry_n, params.get("wq_t"))
    k = project(key, params.get("wk_t"))
    v = project(val, params.get("wv_t"))   # when Identity & val is key -> v is k

    # Attention runs directly on the 'b n (h d)' layout (heads split inside the
    # kernel), so no head transposes are materialised in HBM.
    o = flash_attention_pallas(q, k, v, scale=scale, n_head=n_head,
                               d_head=d_head, causal=causal)

    # to_out: Rearrange('b h n d -> b n (h d)') is already the kernel's output
    # layout; then Linear / Identity.
    w_out_t = params.get("w_out_t")
    if w_out_t is None:
        return o
    return linear_pallas(o.reshape(B * Nq, inner), w_out_t).reshape(B, Nq, -1)


# ----------------------------------------------------------------------------
# Deterministic demo + pure-JAX reference check.
# ----------------------------------------------------------------------------
if __name__ == "__main__":
    B, N = 2, 128
    n_head, d_head = 4, 32
    inner = n_head * d_head          # 128 -> Adapter q/k/v branches = nn.Identity
    d_out = 256                      # != inner -> to_out has a real Linear

    root = jax.random.PRNGKey(0)
    kx, kg, kb, kw = jax.random.split(root, 4)

    qry = jax.random.normal(kx, (B, N, inner), jnp.float32)
    gamma = 1.0 + 0.1 * jax.random.normal(kg, (inner,), jnp.float32)
    beta = 0.1 * jax.random.normal(kb, (inner,), jnp.float32)
    bound = 1.0 / math.sqrt(inner)
    w_out_t = jax.random.uniform(kw, (inner, d_out), jnp.float32,
                                 minval=-bound, maxval=bound)

    params = dict(ln_gamma=gamma, ln_beta=beta,
                  wq_t=None, wk_t=None, wv_t=None,   # d_inp == n_head*d_head
                  w_out_t=w_out_t)

    out = attention_forward(qry, params=params, n_head=n_head, d_head=d_head)
    out = jax.block_until_ready(out)

    # ---- pure-JAX reference (same math, plain softmax) ----
    scale = n_head * d_head ** (-0.5)
    mean = qry.mean(-1, keepdims=True)
    var = ((qry - mean) ** 2).mean(-1, keepdims=True)
    xn = (qry - mean) * jax.lax.rsqrt(var + 1e-5) * gamma + beta
    h = xn.reshape(B, N, n_head, d_head).transpose(0, 2, 1, 3)
    s = jnp.einsum("bhqd,bhkd->bhqk", h, h) * scale
    p = jax.nn.softmax(s, axis=-1)
    a = jnp.einsum("bhqk,bhkd->bhqd", p, h)
    ref = a.transpose(0, 2, 1, 3).reshape(B, N, inner) @ w_out_t

    assert out.shape == (B, N, d_out), out.shape
    max_err = float(jnp.abs(out - ref).max())
    assert jnp.allclose(out, ref, atol=1e-4, rtol=1e-4), max_err

    print("KERNEL_OK")
</pallas_src>

<mosaic_0001>
module attributes {stable_mosaic.version = 11 : i64} {
  func.func @_layernorm_kernel(%arg0: i32, %arg1: memref<256x128xf32, #tpu.memory_space<vmem>>, %arg2: memref<1x128xf32, #tpu.memory_space<vmem>>, %arg3: memref<1x128xf32, #tpu.memory_space<vmem>>, %arg4: memref<256x128xf32, #tpu.memory_space<vmem>>) attributes {dimension_semantics = [#tpu.dimension_semantics<parallel>], iteration_bounds = array<i64: 1>, scalar_prefetch = 0 : i64, scratch_operands = 0 : i64, tpu.core_type = #tpu.core_type<tc>, window_params = [{transform_indices = @transform_0, window_bounds = array<i64: 256, 128>}, {pipeline_mode = #tpu.pipeline_mode<synchronous>, transform_indices = @transform_1, window_bounds = array<i64: 1, 128>}, {pipeline_mode = #tpu.pipeline_mode<synchronous>, transform_indices = @transform_2, window_bounds = array<i64: 1, 128>}, {transform_indices = @transform_3, window_bounds = array<i64: 256, 128>}]} {
    %c0 = arith.constant 0 : index
    %c0_0 = arith.constant 0 : index
    %0 = vector.load %arg1[%c0, %c0_0] : memref<256x128xf32, #tpu.memory_space<vmem>>, vector<256x128xf32>
    %cst = arith.constant dense<0.000000e+00> : vector<256xf32>
    %1 = vector.multi_reduction <add>, %0, %cst [1] : vector<256x128xf32> to vector<256xf32>
    %2 = vector.shape_cast %1 : vector<256xf32> to vector<256x1xf32>
    %cst_1 = arith.constant 1.280000e+02 : f32
    %3 = vector.broadcast %cst_1 : f32 to vector<256x1xf32>
    %4 = arith.divf %2, %3 : vector<256x1xf32>
    %5 = vector.broadcast %4 : vector<256x1xf32> to vector<256x128xf32>
    %6 = arith.subf %0, %5 : vector<256x128xf32>
    %7 = arith.mulf %6, %6 : vector<256x128xf32>
    %cst_2 = arith.constant dense<0.000000e+00> : vector<256xf32>
    %8 = vector.multi_reduction <add>, %7, %cst_2 [1] : vector<256x128xf32> to vector<256xf32>
    %9 = vector.shape_cast %8 : vector<256xf32> to vector<256x1xf32>
    %cst_3 = arith.constant 1.280000e+02 : f32
    %10 = vector.broadcast %cst_3 : f32 to vector<256x1xf32>
    %11 = arith.divf %9, %10 : vector<256x1xf32>
    %cst_4 = arith.constant 9.99999974E-6 : f32
    %12 = vector.broadcast %cst_4 : f32 to vector<256x1xf32>
    %13 = arith.addf %11, %12 : vector<256x1xf32>
    %14 = math.rsqrt %13 : vector<256x1xf32>
    %15 = vector.broadcast %14 : vector<256x1xf32> to vector<256x128xf32>
    %16 = arith.mulf %6, %15 : vector<256x128xf32>
    %c0_5 = arith.constant 0 : index
    %c0_6 = arith.constant 0 : index
    %17 = vector.load %arg2[%c0_5, %c0_6] : memref<1x128xf32, #tpu.memory_space<vmem>>, vector<1x128xf32>
    %18 = vector.broadcast %17 : vector<1x128xf32> to vector<256x128xf32>
    %19 = arith.mulf %16, %18 : vector<256x128xf32>
    %c0_7 = arith.constant 0 : index
    %c0_8 = arith.constant 0 : index
    %20 = vector.load %arg3[%c0_7, %c0_8] : memref<1x128xf32, #tpu.memory_space<vmem>>, vector<1x128xf32>
    %21 = vector.broadcast %20 : vector<1x128xf32> to vector<256x128xf32>
    %22 = arith.addf %19, %21 : vector<256x128xf32>
    %c0_9 = arith.constant 0 : index
    %c0_10 = arith.constant 0 : index
    %23 = vector.load %arg4[%c0_9, %c0_10] : memref<256x128xf32, #tpu.memory_space<vmem>>, vector<256x128xf32>
    tpu.vector_store %arg4[%c0_9, %c0_10], %22 {strides = array<i32>} : memref<256x128xf32, #tpu.memory_space<vmem>>, vector<256x128xf32>,
    return
  }
  func.func @transform_0(%arg0: i32) -> (i32, i32) {
    %c0_i32 = arith.constant 0 : i32
    %c0_i32_0 = arith.constant 0 : i32
    return %arg0, %c0_i32 : i32, i32
  }
  func.func @transform_1(%arg0: i32) -> (i32, i32) {
    %c0_i32 = arith.constant 0 : i32
    %c0_i32_0 = arith.constant 0 : i32
    %c0_i32_1 = arith.constant 0 : i32
    return %c0_i32, %c0_i32_0 : i32, i32
  }
  func.func @transform_2(%arg0: i32) -> (i32, i32) {
    %c0_i32 = arith.constant 0 : i32
    %c0_i32_0 = arith.constant 0 : i32
    %c0_i32_1 = arith.constant 0 : i32
    return %c0_i32, %c0_i32_0 : i32, i32
  }
  func.func @transform_3(%arg0: i32) -> (i32, i32) {
    %c0_i32 = arith.constant 0 : i32
    %c0_i32_0 = arith.constant 0 : i32
    return %arg0, %c0_i32 : i32, i32
  }
}

</mosaic_0001>

<bundles_post_ra>
// kernel: tpu_custom_call.1
= control target key start
LH: loop header
LB: loop body
LE: loop exit
PB: predicated region body
PF: predicated region fallthrough
CT: control target
= control target key end

     0   :  { %8 = vsyncpa [#allocation3], 0  ;;  %s1075_s0 = inlined_call_operand.hbm [shape: f32[256,128], index: 0, kind: input, shape index: {}]   ;;  %s1076_s1 = inlined_call_operand.vmem [shape: f32[1,128], index: 1, kind: input, shape index: {}]   ;;  %s1077_s2 = inlined_call_operand.vmem [shape: f32[1,128], index: 2, kind: input, shape index: {}]   ;;  %s1078_s3 = inlined_call_operand.hbm [shape: f32[256,128], index: 3, kind: output, shape index: {}]  }
   0x1   :  { %9 = vsyncpa [#allocation4], 0  ;;  %s659_s12 = smov [#allocation2]   ;;  %s611_s16 = scalar_lea.hbm %s1075_s0, 4096 }
   0x2   :  { %s15_s13 = sshll.u32 %s659_s12, 4  ;;  %p612_p0 = scmp.ne.s32.totalorder %s1075_s0, %s611_s16  ;;  %s16_s13 = int_to_ptr.vmem [resolvable:$true] %s15_s13 }
   0x3   :  { %p615_p1 = scmp.lt.u32.totalorder %s611_s16, %s1075_s0 }
   0x5   :  { %p617_p2 = pnand %p615_p1, %p612_p0 }
   0x7   :  { %620 = shalt.err (!%p617_p2)
}
   0x8   :  { %s621_s21 = scalar_lea.vmem %s16_s13, 4096  ;;  %p626_p4 = scmp.lt.s32.totalorder %s16_s13, %s16_s13 }
   0x9   :  { %p622_p3 = scmp.ne.s32.totalorder %s16_s13, %s621_s21  ;;  %p627_p5 = scmp.lt.s32.totalorder %s621_s21, %s621_s21 }
   0xb   :  { %p628_p6 = por %p627_p5, %p626_p4 }
   0xd   :  { %p629_p7 = pnand %p628_p6, %p622_p3 }
   0xf   :  { %632 = shalt.err (!%p629_p7)
}
  0x10   :  { %s660_s22 = smov 128   ;;  %s661_s23 = smov 8  }
  0x11   :  { %21 = dma.hbm_to_vmem [thread:$0]  %s1075_s0, 4096, %s16_s13, [#allocation3], %s660_s22, %s660_s22, %s661_s23  }
  0x12   :  { %655 = dma.done.wait [#allocation3], 4096  }
  0x13   :  { %656 = vsyncadd [#allocation3], 4294963200  ;;  %v698_v0 = vld [vmem:[#allocation2] sm:$0xff]  ;;  %v700_v1 = vld [vmem:[#allocation2 + $0x10] sm:$0xff] }
  0x14   :  { %61 = vadd.xlane.f32.xlu0 %v698_v0  ;;  %65 = vadd.xlane.f32.xlu1 %v700_v1  ;;  %v704_v2 = vld [vmem:[#allocation2 + $0x8] sm:$0xff]  ;;  %v706_v3 = vld [vmem:[#allocation2 + $0x18] sm:$0xff]  ;;  %v710_v4 = vld [vmem:[#allocation2 + $0x20] sm:$0xff] }
  0x15   :  { %v712_v5 = vld [vmem:[#allocation2 + $0x28] sm:$0xff]  ;;  %v716_v6 = vld [vmem:[#allocation2 + $0x30] sm:$0xff]  ;;  %v718_v7 = vld [vmem:[#allocation2 + $0x38] sm:$0xff] }
  0x16   :  { %v722_v8 = vld [vmem:[#allocation2 + $0x40] sm:$0xff]  ;;  %v724_v9 = vld [vmem:[#allocation2 + $0x48] sm:$0xff]  ;;  %v728_v10 = vld [vmem:[#allocation2 + $0x50] sm:$0xff] }
  0x17   :  { %v730_v11 = vld [vmem:[#allocation2 + $0x58] sm:$0xff]  ;;  %v734_v12 = vld [vmem:[#allocation2 + $0x60] sm:$0xff]  ;;  %v736_v13 = vld [vmem:[#allocation2 + $0x68] sm:$0xff] }
  0x18   :  { %63 = vadd.xlane.f32.xlu0 %v704_v2  ;;  %67 = vadd.xlane.f32.xlu1 %v706_v3  ;;  %v740_v14 = vld [vmem:[#allocation2 + $0x70] sm:$0xff]  ;;  %v742_v15 = vld [vmem:[#allocation2 + $0x78] sm:$0xff]  ;;  %v746_v16 = vld [vmem:[#allocation2 + $0x80] sm:$0xff] }
  0x19   :  { %v748_v17 = vld [vmem:[#allocation2 + $0x88] sm:$0xff]  ;;  %v752_v18 = vld [vmem:[#allocation2 + $0x90] sm:$0xff]  ;;  %v754_v19 = vld [vmem:[#allocation2 + $0x98] sm:$0xff] }
  0x1a   :  { %v758_v20 = vld [vmem:[#allocation2 + $0xa0] sm:$0xff]  ;;  %v760_v21 = vld [vmem:[#allocation2 + $0xa8] sm:$0xff]  ;;  %v764_v22 = vld [vmem:[#allocation2 + $0xb0] sm:$0xff] }
  0x1b   :  { %v766_v23 = vld [vmem:[#allocation2 + $0xb8] sm:$0xff]  ;;  %v770_v24 = vld [vmem:[#allocation2 + $0xc0] sm:$0xff]  ;;  %v772_v25 = vld [vmem:[#allocation2 + $0xc8] sm:$0xff] }
  0x1c   :  { %69 = vadd.xlane.f32.xlu0 %v710_v4  ;;  %71 = vadd.xlane.f32.xlu1 %v712_v5  ;;  %v776_v26 = vld [vmem:[#allocation2 + $0xd0] sm:$0xff]  ;;  %v778_v27 = vld [vmem:[#allocation2 + $0xd8] sm:$0xff]  ;;  %v782_v28 = vld [vmem:[#allocation2 + $0xe0] sm:$0xff] }
  0x1d   :  { %v784_v29 = vld [vmem:[#allocation2 + $0xe8] sm:$0xff]  ;;  %v788_v30 = vld [vmem:[#allocation2 + $0xf0] sm:$0xff]  ;;  %v790_v31 = vld [vmem:[#allocation2 + $0xf8] sm:$0xff] }
  0x20   :  { %73 = vadd.xlane.f32.xlu0 %v716_v6  ;;  %75 = vadd.xlane.f32.xlu1 %v718_v7 }
  0x24   :  { %77 = vadd.xlane.f32.xlu0 %v722_v8  ;;  %79 = vadd.xlane.f32.xlu1 %v724_v9 }
  0x28   :  { %81 = vadd.xlane.f32.xlu0 %v728_v10  ;;  %83 = vadd.xlane.f32.xlu1 %v730_v11 }
  0x2c   :  { %85 = vadd.xlane.f32.xlu0 %v734_v12  ;;  %87 = vadd.xlane.f32.xlu1 %v736_v13 }
  0x30   :  { %89 = vadd.xlane.f32.xlu0 %v740_v14  ;;  %91 = vadd.xlane.f32.xlu1 %v742_v15 }
  0x34   :  { %93 = vadd.xlane.f32.xlu0 %v746_v16  ;;  %95 = vadd.xlane.f32.xlu1 %v748_v17 }
  0x38   :  { %97 = vadd.xlane.f32.xlu0 %v752_v18  ;;  %99 = vadd.xlane.f32.xlu1 %v754_v19 }
  0x3c   :  { %101 = vadd.xlane.f32.xlu0 %v758_v20  ;;  %103 = vadd.xlane.f32.xlu1 %v760_v21 }
  0x40   :  { %105 = vadd.xlane.f32.xlu0 %v764_v22  ;;  %107 = vadd.xlane.f32.xlu1 %v766_v23 }
  0x44   :  { %109 = vadd.xlane.f32.xlu0 %v770_v24  ;;  %111 = vadd.xlane.f32.xlu1 %v772_v25 }
  0x48   :  { %113 = vadd.xlane.f32.xlu0 %v776_v26  ;;  %115 = vadd.xlane.f32.xlu1 %v778_v27 }
  0x4c   :  { %117 = vadd.xlane.f32.xlu0 %v782_v28  ;;  %119 = vadd.xlane.f32.xlu1 %v784_v29 }
  0x50   :  { %121 = vadd.xlane.f32.xlu0 %v788_v30  ;;  %123 = vadd.xlane.f32.xlu1 %v790_v31 }
  0xa1   :  { %v62_v32 = vpop.xlane.xlu0 %61  ;;  %v66_v33 = vpop.xlane.xlu1 %65 }
  0xa2   :  { %v126_v34 = vmul.f32 0.0078125, %v62_v32  ;;  %v128_v35 = vmul.f32 0.0078125, %v66_v33 }
  0xa4   :  { %v795_v36 = vsub.f32 %v698_v0, %v126_v34  ;;  %v798_v37 = vsub.f32 %v700_v1, %v128_v35 }
  0xa5   :  { %v64_v38 = vpop.xlane.xlu0 %63  ;;  %v68_v39 = vpop.xlane.xlu1 %67 }
  0xa6   :  { %v127_v40 = vmul.f32 0.0078125, %v64_v38  ;;  %v190_v41 = vmul.f32 %v795_v36, %v795_v36  ;;  %v129_v42 = vmul.f32 0.0078125, %v68_v39  ;;  %v192_v45 = vmul.f32 %v798_v37, %v798_v37 }
  0xa8   :  { %v803_v43 = vsub.f32 %v704_v2, %v127_v40  ;;  %222 = vadd.xlane.f32.xlu0 %v190_v41  ;;  %v806_v44 = vsub.f32 %v706_v3, %v129_v42 }
  0xa9   :  { %v70_v46 = vpop.xlane.xlu0 %69  ;;  %v72_v47 = vpop.xlane.xlu1 %71 }
  0xaa   :  { %v130_v48 = vmul.f32 0.0078125, %v70_v46  ;;  %v191_v49 = vmul.f32 %v803_v43, %v803_v43  ;;  %v131_v50 = vmul.f32 0.0078125, %v72_v47  ;;  %v193_v53 = vmul.f32 %v806_v44, %v806_v44 }
  0xac   :  { %v813_v51 = vsub.f32 %v710_v4, %v130_v48  ;;  %226 = vadd.xlane.f32.xlu0 %v192_v45  ;;  %224 = vadd.xlane.f32.xlu1 %v191_v49  ;;  %v816_v52 = vsub.f32 %v712_v5, %v131_v50 }
  0xad   :  { %v74_v54 = vpop.xlane.xlu0 %73  ;;  %v76_v55 = vpop.xlane.xlu1 %75 }
  0xae   :  { %v132_v56 = vmul.f32 0.0078125, %v74_v54  ;;  %v194_v57 = vmul.f32 %v813_v51, %v813_v51  ;;  %v133_v58 = vmul.f32 0.0078125, %v76_v55  ;;  %v195_v61 = vmul.f32 %v816_v52, %v816_v52 }
  0xb0   :  { %v823_v59 = vsub.f32 %v716_v6, %v132_v56  ;;  %228 = vadd.xlane.f32.xlu1 %v193_v53  ;;  %230 = vadd.xlane.f32.xlu0 %v194_v57  ;;  %v826_v60 = vsub.f32 %v718_v7, %v133_v58 }
  0xb1   :  { %v78_v62 = vpop.xlane.xlu0 %77  ;;  %v80_v63 = vpop.xlane.xlu1 %79 }
  0xb2   :  { %v134_v0 = vmul.f32 0.0078125, %v78_v62  ;;  %v196_v1 = vmul.f32 %v823_v59, %v823_v59  ;;  %v135_v2 = vmul.f32 0.0078125, %v80_v63  ;;  %v197_v5 = vmul.f32 %v826_v60, %v826_v60 }
  0xb4   :  { %v833_v3 = vsub.f32 %v722_v8, %v134_v0  ;;  %232 = vadd.xlane.f32.xlu1 %v195_v61  ;;  %234 = vadd.xlane.f32.xlu0 %v196_v1  ;;  %v836_v4 = vsub.f32 %v724_v9, %v135_v2 }
  0xb5   :  { %v82_v6 = vpop.xlane.xlu0 %81  ;;  %v84_v7 = vpop.xlane.xlu1 %83 }
  0xb6   :  { %v136_v32 = vmul.f32 0.0078125, %v82_v6  ;;  %v198_v33 = vmul.f32 %v833_v3, %v833_v3  ;;  %v137_v34 = vmul.f32 0.0078125, %v84_v7  ;;  %v199_v9 = vmul.f32 %v836_v4, %v836_v4 }
  0xb8   :  { %v843_v35 = vsub.f32 %v728_v10, %v136_v32  ;;  %236 = vadd.xlane.f32.xlu1 %v197_v5  ;;  %238 = vadd.xlane.f32.xlu0 %v198_v33  ;;  %v846_v8 = vsub.f32 %v730_v11, %v137_v34 }
  0xb9   :  { %v86_v38 = vpop.xlane.xlu0 %85  ;;  %v88_v39 = vpop.xlane.xlu1 %87 }
  0xba   :  { %v138_v40 = vmul.f32 0.0078125, %v86_v38  ;;  %v200_v41 = vmul.f32 %v843_v35, %v843_v35  ;;  %v139_v42 = vmul.f32 0.0078125, %v88_v39  ;;  %v201_v11 = vmul.f32 %v846_v8, %v846_v8 }
  0xbc   :  { %v853_v45 = vsub.f32 %v734_v12, %v138_v40  ;;  %240 = vadd.xlane.f32.xlu1 %v199_v9  ;;  %242 = vadd.xlane.f32.xlu0 %v200_v41  ;;  %v856_v10 = vsub.f32 %v736_v13, %v139_v42 }
  0xbd   :  { %v90_v46 = vpop.xlane.xlu0 %89  ;;  %v92_v47 = vpop.xlane.xlu1 %91 }
  0xbe   :  { %v140_v48 = vmul.f32 0.0078125, %v90_v46  ;;  %v202_v49 = vmul.f32 %v853_v45, %v853_v45  ;;  %v141_v50 = vmul.f32 0.0078125, %v92_v47  ;;  %v203_v13 = vmul.f32 %v856_v10, %v856_v10 }
  0xc0   :  { %v863_v53 = vsub.f32 %v740_v14, %v140_v48  ;;  %244 = vadd.xlane.f32.xlu1 %v201_v11  ;;  %246 = vadd.xlane.f32.xlu0 %v202_v49  ;;  %v866_v12 = vsub.f32 %v742_v15, %v141_v50 }
  0xc1   :  { %v94_v54 = vpop.xlane.xlu0 %93  ;;  %v96_v55 = vpop.xlane.xlu1 %95 }
  0xc2   :  { %v142_v56 = vmul.f32 0.0078125, %v94_v54  ;;  %v204_v57 = vmul.f32 %v863_v53, %v863_v53  ;;  %v143_v58 = vmul.f32 0.0078125, %v96_v55  ;;  %v205_v15 = vmul.f32 %v866_v12, %v866_v12 }
  0xc4   :  { %v873_v61 = vsub.f32 %v746_v16, %v142_v56  ;;  %248 = vadd.xlane.f32.xlu1 %v203_v13  ;;  %250 = vadd.xlane.f32.xlu0 %v204_v57  ;;  %v876_v14 = vsub.f32 %v748_v17, %v143_v58 }
  0xc5   :  { %v98_v62 = vpop.xlane.xlu0 %97  ;;  %v100_v63 = vpop.xlane.xlu1 %99 }
  0xc6   :  { %v144_v0 = vmul.f32 0.0078125, %v98_v62  ;;  %v206_v1 = vmul.f32 %v873_v61, %v873_v61  ;;  %v145_v2 = vmul.f32 0.0078125, %v100_v63  ;;  %v207_v17 = vmul.f32 %v876_v14, %v876_v14 }
  0xc8   :  { %v883_v5 = vsub.f32 %v752_v18, %v144_v0  ;;  %252 = vadd.xlane.f32.xlu1 %v205_v15  ;;  %254 = vadd.xlane.f32.xlu0 %v206_v1  ;;  %v886_v16 = vsub.f32 %v754_v19, %v145_v2 }
  0xc9   :  { %v102_v6 = vpop.xlane.xlu0 %101  ;;  %v104_v7 = vpop.xlane.xlu1 %103 }
  0xca   :  { %v146_v32 = vmul.f32 0.0078125, %v102_v6  ;;  %v208_v33 = vmul.f32 %v883_v5, %v883_v5  ;;  %v147_v34 = vmul.f32 0.0078125, %v104_v7  ;;  %v209_v19 = vmul.f32 %v886_v16, %v886_v16 }
  0xcc   :  { %v893_v9 = vsub.f32 %v758_v20, %v146_v32  ;;  %256 = vadd.xlane.f32.xlu1 %v207_v17  ;;  %258 = vadd.xlane.f32.xlu0 %v208_v33  ;;  %v896_v18 = vsub.f32 %v760_v21, %v147_v34 }
  0xcd   :  { %v106_v38 = vpop.xlane.xlu0 %105  ;;  %v108_v39 = vpop.xlane.xlu1 %107 }
  0xce   :  { %v148_v40 = vmul.f32 0.0078125, %v106_v38  ;;  %v210_v41 = vmul.f32 %v893_v9, %v893_v9  ;;  %v149_v42 = vmul.f32 0.0078125, %v108_v39  ;;  %v211_v21 = vmul.f32 %v896_v18, %v896_v18 }
  0xd0   :  { %v903_v11 = vsub.f32 %v764_v22, %v148_v40  ;;  %260 = vadd.xlane.f32.xlu1 %v209_v19  ;;  %262 = vadd.xlane.f32.xlu0 %v210_v41  ;;  %v906_v20 = vsub.f32 %v766_v23, %v149_v42 }
  0xd1   :  { %v110_v46 = vpop.xlane.xlu0 %109  ;;  %v112_v47 = vpop.xlane.xlu1 %111 }
  0xd2   :  { %v150_v48 = vmul.f32 0.0078125, %v110_v46  ;;  %v212_v49 = vmul.f32 %v903_v11, %v903_v11  ;;  %v151_v50 = vmul.f32 0.0078125, %v112_v47  ;;  %v213_v23 = vmul.f32 %v906_v20, %v906_v20 }
  0xd4   :  { %v913_v13 = vsub.f32 %v770_v24, %v150_v48  ;;  %264 = vadd.xlane.f32.xlu1 %v211_v21  ;;  %266 = vadd.xlane.f32.xlu0 %v212_v49  ;;  %v916_v22 = vsub.f32 %v772_v25, %v151_v50 }
  0xd5   :  { %v114_v54 = vpop.xlane.xlu0 %113  ;;  %v116_v55 = vpop.xlane.xlu1 %115 }
  0xd6   :  { %v152_v56 = vmul.f32 0.0078125, %v114_v54  ;;  %v214_v57 = vmul.f32 %v913_v13, %v913_v13  ;;  %v153_v58 = vmul.f32 0.0078125, %v116_v55  ;;  %v215_v25 = vmul.f32 %v916_v22, %v916_v22 }
  0xd8   :  { %v923_v15 = vsub.f32 %v776_v26, %v152_v56  ;;  %268 = vadd.xlane.f32.xlu1 %v213_v23  ;;  %270 = vadd.xlane.f32.xlu0 %v214_v57  ;;  %v926_v24 = vsub.f32 %v778_v27, %v153_v58 }
  0xd9   :  { %v118_v62 = vpop.xlane.xlu0 %117  ;;  %v120_v63 = vpop.xlane.xlu1 %119 }
  0xda   :  { %v154_v0 = vmul.f32 0.0078125, %v118_v62  ;;  %v216_v1 = vmul.f32 %v923_v15, %v923_v15  ;;  %v155_v2 = vmul.f32 0.0078125, %v120_v63  ;;  %v217_v27 = vmul.f32 %v926_v24, %v926_v24 }
  0xdc   :  { %v933_v17 = vsub.f32 %v782_v28, %v154_v0  ;;  %272 = vadd.xlane.f32.xlu1 %v215_v25  ;;  %274 = vadd.xlane.f32.xlu0 %v216_v1  ;;  %v936_v26 = vsub.f32 %v784_v29, %v155_v2  ;;  %v957_v0 = vld [vmem:[%s1076_s1] ss:$0 sm:$0xff]  ;;  %s662_s1 = smov [#allocation5]  }
  0xdd   :  { %v122_v6 = vpop.xlane.xlu0 %121  ;;  %v124_v7 = vpop.xlane.xlu1 %123 }
  0xde   :  { %v156_v32 = vmul.f32 0.0078125, %v122_v6  ;;  %v218_v33 = vmul.f32 %v933_v17, %v933_v17  ;;  %v157_v34 = vmul.f32 0.0078125, %v124_v7  ;;  %v219_v29 = vmul.f32 %v936_v26, %v936_v26 }
  0xe0   :  { %v943_v19 = vsub.f32 %v788_v30, %v156_v32  ;;  %276 = vadd.xlane.f32.xlu1 %v217_v27  ;;  %278 = vadd.xlane.f32.xlu0 %v218_v33  ;;  %v946_v28 = vsub.f32 %v790_v31, %v157_v34  ;;  %v963_v32 = vld [vmem:[%s1077_s2] ss:$0 sm:$0xff]  ;;  %s529_s2 = sshll.u32 %s662_s1, 4  ;;  %s530_s2 = int_to_ptr.vmem [resolvable:$true] %s529_s2 }
  0xe1   :  { %s633_s29 = scalar_lea.vmem %s530_s2, 4096  ;;  %p638_p9 = scmp.lt.s32.totalorder %s530_s2, %s530_s2 }
  0xe2   :  { %v220_v38 = vmul.f32 %v943_v19, %v943_v19  ;;  %v221_v39 = vmul.f32 %v946_v28, %v946_v28  ;;  %p634_p8 = scmp.ne.s32.totalorder %s530_s2, %s633_s29  ;;  %p639_p10 = scmp.lt.s32.totalorder %s633_s29, %s633_s29 }
  0xe4   :  { %280 = vadd.xlane.f32.xlu1 %v219_v29  ;;  %282 = vadd.xlane.f32.xlu0 %v220_v38  ;;  %p640_p11 = por %p639_p10, %p638_p9 }
  0xe6   :  { %p641_p12 = pnand %p640_p11, %p634_p8 }
  0xe8   :  { %284 = vadd.xlane.f32.xlu1 %v221_v39 }
 0x135   :  { %v223_v40 = vpop.xlane.xlu0 %222 }
 0x136   :  { %v286_v30 = vmul.f32 0.0078125, %v223_v40 }
 0x138   :  { %v318_v41 = vadd.f32 1e-05, %v286_v30 }
 0x139   :  { %v225_v42 = vpop.xlane.xlu1 %224  ;;  %v227_v21 = vpop.xlane.xlu0 %226 }
 0x13a   :  { %547 = vrsqrt.f32 %v318_v41  ;;  %v287_v31 = vmul.f32 0.0078125, %v225_v42  ;;  %v288_v46 = vmul.f32 0.0078125, %v227_v21 }
 0x13c   :  { %v319_v47 = vadd.f32 1e-05, %v287_v31  ;;  %v320_v48 = vadd.f32 1e-05, %v288_v46 }
 0x13d   :  { %v229_v49 = vpop.xlane.xlu1 %228  ;;  %v231_v50 = vpop.xlane.xlu0 %230 }
 0x13e   :  { %549 = vrsqrt.f32 %v319_v47  ;;  %v289_v23 = vmul.f32 0.0078125, %v229_v49  ;;  %v290_v54 = vmul.f32 0.0078125, %v231_v50 }
 0x13f   :  { %551 = vrsqrt.f32 %v320_v48 }
 0x140   :  { %v321_v55 = vadd.f32 1e-05, %v289_v23  ;;  %v322_v56 = vadd.f32 1e-05, %v290_v54 }
 0x141   :  { %v233_v57 = vpop.xlane.xlu1 %232  ;;  %v235_v58 = vpop.xlane.xlu0 %234 }
 0x142   :  { %553 = vrsqrt.f32 %v321_v55  ;;  %v291_v25 = vmul.f32 0.0078125, %v233_v57  ;;  %v292_v62 = vmul.f32 0.0078125, %v235_v58 }
 0x143   :  { %555 = vrsqrt.f32 %v322_v56 }
 0x144   :  { %v548_v63 = vpop.eup %547  ;;  %v323_v1 = vadd.f32 1e-05, %v291_v25  ;;  %v324_v2 = vadd.f32 1e-05, %v292_v62 }
 0x145   :  { %v382_v27 = vmul.f32 %v548_v63, %v795_v36  ;;  %v237_v6 = vpop.xlane.xlu1 %236  ;;  %v239_v7 = vpop.xlane.xlu0 %238 }
 0x146   :  { %557 = vrsqrt.f32 %v323_v1  ;;  %v293_v33 = vmul.f32 0.0078125, %v237_v6  ;;  %v294_v34 = vmul.f32 0.0078125, %v239_v7 }
 0x147   :  { %v421_v29 = vmul.f32 %v957_v0, %v382_v27  ;;  %559 = vrsqrt.f32 %v324_v2 }
 0x148   :  { %v550_v38 = vpop.eup %549  ;;  %v325_v39 = vadd.f32 1e-05, %v293_v33  ;;  %v326_v40 = vadd.f32 1e-05, %v294_v34 }
 0x149   :  { %v552_v30 = vpop.eup %551  ;;  %v460_v41 = vadd.f32 %v963_v32, %v421_v29  ;;  %v383_v36 = vmul.f32 %v550_v38, %v803_v43  ;;  %v241_v42 = vpop.xlane.xlu1 %240 }
 0x14a   :  { %v243_v21 = vpop.xlane.xlu0 %242  ;;  %v384_v31 = vmul.f32 %v552_v30, %v798_v37  ;;  %561 = vrsqrt.f32 %v325_v39  ;;  %v295_v46 = vmul.f32 0.0078125, %v241_v42 }
 0x14b   :  { %v296_v47 = vmul.f32 0.0078125, %v243_v21  ;;  %492 = vst [vmem:[#allocation5] sm:$0xff] %v460_v41  ;;  %v422_v48 = vmul.f32 %v957_v0, %v383_v36  ;;  %563 = vrsqrt.f32 %v326_v40 }
 0x14c   :  { %v554_v49 = vpop.eup %553  ;;  %v423_v50 = vmul.f32 %v957_v0, %v384_v31  ;;  %v327_v23 = vadd.f32 1e-05, %v295_v46 }
 0x14d   :  { %v328_v54 = vadd.f32 1e-05, %v296_v47  ;;  %v556_v55 = vpop.eup %555  ;;  %v461_v56 = vadd.f32 %v963_v32, %v422_v48  ;;  %v385_v43 = vmul.f32 %v554_v49, %v806_v44  ;;  %v245_v57 = vpop.xlane.xlu1 %244 }
 0x14e   :  { %v247_v58 = vpop.xlane.xlu0 %246  ;;  %v462_v37 = vadd.f32 %v963_v32, %v423_v50  ;;  %v386_v25 = vmul.f32 %v556_v55, %v813_v51  ;;  %565 = vrsqrt.f32 %v327_v23  ;;  %v297_v62 = vmul.f32 0.0078125, %v245_v57 }
 0x14f   :  { %493 = vst [vmem:[#allocation5 + $0x8] sm:$0xff] %v461_v56  ;;  %v424_v63 = vmul.f32 %v957_v0, %v385_v43  ;;  %567 = vrsqrt.f32 %v328_v54  ;;  %v298_v1 = vmul.f32 0.0078125, %v247_v58 }
 0x150   :  { %v558_v2 = vpop.eup %557  ;;  %494 = vst [vmem:[#allocation5 + $0x10] sm:$0xff] %v462_v37  ;;  %v425_v27 = vmul.f32 %v957_v0, %v386_v25  ;;  %v329_v6 = vadd.f32 1e-05, %v297_v62 }
 0x151   :  { %v560_v7 = vpop.eup %559  ;;  %v463_v44 = vadd.f32 %v963_v32, %v424_v63  ;;  %v387_v33 = vmul.f32 %v558_v2, %v816_v52  ;;  %v330_v34 = vadd.f32 1e-05, %v298_v1  ;;  %v249_v29 = vpop.xlane.xlu1 %248 }
 0x152   :  { %v251_v51 = vpop.xlane.xlu0 %250  ;;  %v464_v38 = vadd.f32 %v963_v32, %v425_v27  ;;  %v388_v39 = vmul.f32 %v560_v7, %v823_v59  ;;  %569 = vrsqrt.f32 %v329_v6  ;;  %v299_v40 = vmul.f32 0.0078125, %v249_v29 }
 0x153   :  { %495 = vst [vmem:[#allocation5 + $0x18] sm:$0xff] %v463_v44  ;;  %v426_v30 = vmul.f32 %v957_v0, %v387_v33  ;;  %571 = vrsqrt.f32 %v330_v34  ;;  %v300_v41 = vmul.f32 0.0078125, %v251_v51 }
 0x154   :  { %v562_v36 = vpop.eup %561  ;;  %496 = vst [vmem:[#allocation5 + $0x20] sm:$0xff] %v464_v38  ;;  %v427_v42 = vmul.f32 %v957_v0, %v388_v39  ;;  %v331_v21 = vadd.f32 1e-05, %v299_v40 }
 0x155   :  { %v564_v52 = vpop.eup %563  ;;  %v465_v31 = vadd.f32 %v963_v32, %v426_v30  ;;  %v389_v46 = vmul.f32 %v562_v36, %v826_v60  ;;  %v332_v47 = vadd.f32 1e-05, %v300_v41  ;;  %v253_v48 = vpop.xlane.xlu1 %252 }
 0x156   :  { %v255_v59 = vpop.xlane.xlu0 %254  ;;  %v466_v49 = vadd.f32 %v963_v32, %v427_v42  ;;  %v390_v50 = vmul.f32 %v564_v52, %v833_v3  ;;  %573 = vrsqrt.f32 %v331_v21  ;;  %v301_v23 = vmul.f32 0.0078125, %v253_v48 }
 0x157   :  { %497 = vst [vmem:[#allocation5 + $0x28] sm:$0xff] %v465_v31  ;;  %v428_v54 = vmul.f32 %v957_v0, %v389_v46  ;;  %575 = vrsqrt.f32 %v332_v47  ;;  %v302_v55 = vmul.f32 0.0078125, %v255_v59 }
 0x158   :  { %v566_v56 = vpop.eup %565  ;;  %498 = vst [vmem:[#allocation5 + $0x30] sm:$0xff] %v466_v49  ;;  %v429_v43 = vmul.f32 %v957_v0, %v390_v50  ;;  %v333_v57 = vadd.f32 1e-05, %v301_v23 }
 0x159   :  { %v568_v60 = vpop.eup %567  ;;  %v467_v58 = vadd.f32 %v963_v32, %v428_v54  ;;  %v391_v37 = vmul.f32 %v566_v56, %v836_v4  ;;  %v334_v25 = vadd.f32 1e-05, %v302_v55  ;;  %v257_v62 = vpop.xlane.xlu1 %256 }
 0x15a   :  { %v259_v3 = vpop.xlane.xlu0 %258  ;;  %v468_v63 = vadd.f32 %v963_v32, %v429_v43  ;;  %v392_v1 = vmul.f32 %v568_v60, %v843_v35  ;;  %577 = vrsqrt.f32 %v333_v57  ;;  %v303_v2 = vmul.f32 0.0078125, %v257_v62 }
 0x15b   :  { %499 = vst [vmem:[#allocation5 + $0x38] sm:$0xff] %v467_v58  ;;  %v430_v27 = vmul.f32 %v957_v0, %v391_v37  ;;  %579 = vrsqrt.f32 %v334_v25  ;;  %v304_v6 = vmul.f32 0.0078125, %v259_v3 }
 0x15c   :  { %v570_v7 = vpop.eup %569  ;;  %500 = vst [vmem:[#allocation5 + $0x40] sm:$0xff] %v468_v63  ;;  %v431_v44 = vmul.f32 %v957_v0, %v392_v1  ;;  %v335_v33 = vadd.f32 1e-05, %v303_v2 }
 0x15d   :  { %v572_v4 = vpop.eup %571  ;;  %v469_v34 = vadd.f32 %v963_v32, %v430_v27  ;;  %v393_v29 = vmul.f32 %v570_v7, %v846_v8  ;;  %v336_v51 = vadd.f32 1e-05, %v304_v6  ;;  %v261_v38 = vpop.xlane.xlu1 %260 }
 0x15e   :  { %v263_v35 = vpop.xlane.xlu0 %262  ;;  %v470_v39 = vadd.f32 %v963_v32, %v431_v44  ;;  %v394_v40 = vmul.f32 %v572_v4, %v853_v45  ;;  %581 = vrsqrt.f32 %v335_v33  ;;  %v305_v30 = vmul.f32 0.0078125, %v261_v38 }
 0x15f   :  { %501 = vst [vmem:[#allocation5 + $0x48] sm:$0xff] %v469_v34  ;;  %v432_v41 = vmul.f32 %v957_v0, %v393_v29  ;;  %583 = vrsqrt.f32 %v336_v51  ;;  %v306_v36 = vmul.f32 0.0078125, %v263_v35 }
 0x160   :  { %v574_v42 = vpop.eup %573  ;;  %502 = vst [vmem:[#allocation5 + $0x50] sm:$0xff] %v470_v39  ;;  %v433_v21 = vmul.f32 %v957_v0, %v394_v40  ;;  %v337_v52 = vadd.f32 1e-05, %v305_v30 }
 0x161   :  { %v576_v8 = vpop.eup %575  ;;  %v471_v31 = vadd.f32 %v963_v32, %v432_v41  ;;  %v395_v46 = vmul.f32 %v574_v42, %v856_v10  ;;  %v338_v47 = vadd.f32 1e-05, %v306_v36  ;;  %v265_v48 = vpop.xlane.xlu1 %264 }
 0x162   :  { %v267_v45 = vpop.xlane.xlu0 %266  ;;  %v472_v59 = vadd.f32 %v963_v32, %v433_v21  ;;  %v396_v49 = vmul.f32 %v576_v8, %v863_v53  ;;  %585 = vrsqrt.f32 %v337_v52  ;;  %v307_v50 = vmul.f32 0.0078125, %v265_v48 }
 0x163   :  { %503 = vst [vmem:[#allocation5 + $0x58] sm:$0xff] %v471_v31  ;;  %v434_v23 = vmul.f32 %v957_v0, %v395_v46  ;;  %587 = vrsqrt.f32 %v338_v47  ;;  %v308_v54 = vmul.f32 0.0078125, %v267_v45 }
 0x164   :  { %v578_v55 = vpop.eup %577  ;;  %504 = vst [vmem:[#allocation5 + $0x60] sm:$0xff] %v472_v59  ;;  %v435_v56 = vmul.f32 %v957_v0, %v396_v49  ;;  %v339_v43 = vadd.f32 1e-05, %v307_v50 }
 0x165   :  { %v580_v10 = vpop.eup %579  ;;  %v473_v57 = vadd.f32 %v963_v32, %v434_v23  ;;  %v397_v60 = vmul.f32 %v578_v55, %v866_v12  ;;  %v340_v58 = vadd.f32 1e-05, %v308_v54  ;;  %v269_v37 = vpop.xlane.xlu1 %268 }
 0x166   :  { %v271_v53 = vpop.xlane.xlu0 %270  ;;  %v474_v25 = vadd.f32 %v963_v32, %v435_v56  ;;  %v398_v62 = vmul.f32 %v580_v10, %v873_v61  ;;  %589 = vrsqrt.f32 %v339_v43  ;;  %v309_v3 = vmul.f32 0.0078125, %v269_v37 }
 0x167   :  { %505 = vst [vmem:[#allocation5 + $0x68] sm:$0xff] %v473_v57  ;;  %v436_v63 = vmul.f32 %v957_v0, %v397_v60  ;;  %591 = vrsqrt.f32 %v340_v58  ;;  %v310_v1 = vmul.f32 0.0078125, %v271_v53 }
 0x168   :  { %v582_v2 = vpop.eup %581  ;;  %506 = vst [vmem:[#allocation5 + $0x70] sm:$0xff] %v474_v25  ;;  %v437_v27 = vmul.f32 %v957_v0, %v398_v62  ;;  %v341_v6 = vadd.f32 1e-05, %v309_v3 }
 0x169   :  { %v584_v12 = vpop.eup %583  ;;  %v475_v7 = vadd.f32 %v963_v32, %v436_v63  ;;  %v399_v44 = vmul.f32 %v582_v2, %v876_v14  ;;  %v342_v33 = vadd.f32 1e-05, %v310_v1  ;;  %v273_v4 = vpop.xlane.xlu1 %272 }
 0x16a   :  { %v275_v61 = vpop.xlane.xlu0 %274  ;;  %v476_v34 = vadd.f32 %v963_v32, %v437_v27  ;;  %v400_v29 = vmul.f32 %v584_v12, %v883_v5  ;;  %593 = vrsqrt.f32 %v341_v6  ;;  %v311_v51 = vmul.f32 0.0078125, %v273_v4 }
 0x16b   :  { %507 = vst [vmem:[#allocation5 + $0x78] sm:$0xff] %v475_v7  ;;  %v438_v38 = vmul.f32 %v957_v0, %v399_v44  ;;  %595 = vrsqrt.f32 %v342_v33  ;;  %v312_v35 = vmul.f32 0.0078125, %v275_v61 }
 0x16c   :  { %v586_v39 = vpop.eup %585  ;;  %508 = vst [vmem:[#allocation5 + $0x80] sm:$0xff] %v476_v34  ;;  %v439_v40 = vmul.f32 %v957_v0, %v400_v29  ;;  %v343_v30 = vadd.f32 1e-05, %v311_v51 }
 0x16d   :  { %v588_v14 = vpop.eup %587  ;;  %v477_v41 = vadd.f32 %v963_v32, %v438_v38  ;;  %v401_v36 = vmul.f32 %v586_v39, %v886_v16  ;;  %v344_v42 = vadd.f32 1e-05, %v312_v35  ;;  %v277_v21 = vpop.xlane.xlu1 %276 }
 0x16e   :  { %v279_v5 = vpop.xlane.xlu0 %278  ;;  %v478_v52 = vadd.f32 %v963_v32, %v439_v40  ;;  %v402_v8 = vmul.f32 %v588_v14, %v893_v9  ;;  %597 = vrsqrt.f32 %v343_v30  ;;  %v313_v31 = vmul.f32 0.0078125, %v277_v21 }
 0x16f   :  { %509 = vst [vmem:[#allocation5 + $0x88] sm:$0xff] %v477_v41  ;;  %v440_v46 = vmul.f32 %v957_v0, %v401_v36  ;;  %599 = vrsqrt.f32 %v344_v42  ;;  %v314_v47 = vmul.f32 0.0078125, %v279_v5 }
 0x170   :  { %v590_v48 = vpop.eup %589  ;;  %510 = vst [vmem:[#allocation5 + $0x90] sm:$0xff] %v478_v52  ;;  %v441_v45 = vmul.f32 %v957_v0, %v402_v8  ;;  %v345_v59 = vadd.f32 1e-05, %v313_v31 }
 0x171   :  { %v592_v16 = vpop.eup %591  ;;  %v479_v49 = vadd.f32 %v963_v32, %v440_v46  ;;  %v403_v50 = vmul.f32 %v590_v48, %v896_v18  ;;  %v346_v23 = vadd.f32 1e-05, %v314_v47  ;;  %v281_v54 = vpop.xlane.xlu1 %280 }
 0x172   :  { %v283_v9 = vpop.xlane.xlu0 %282  ;;  %v480_v55 = vadd.f32 %v963_v32, %v441_v45  ;;  %v404_v56 = vmul.f32 %v592_v16, %v903_v11  ;;  %601 = vrsqrt.f32 %v345_v59  ;;  %v315_v43 = vmul.f32 0.0078125, %v281_v54 }
 0x173   :  { %511 = vst [vmem:[#allocation5 + $0x98] sm:$0xff] %v479_v49  ;;  %v442_v10 = vmul.f32 %v957_v0, %v403_v50  ;;  %603 = vrsqrt.f32 %v346_v23  ;;  %v316_v57 = vmul.f32 0.0078125, %v283_v9 }
 0x174   :  { %v594_v60 = vpop.eup %593  ;;  %512 = vst [vmem:[#allocation5 + $0xa0] sm:$0xff] %v480_v55  ;;  %v443_v58 = vmul.f32 %v957_v0, %v404_v56  ;;  %v347_v37 = vadd.f32 1e-05, %v315_v43 }
 0x175   :  { %v596_v18 = vpop.eup %595  ;;  %v481_v53 = vadd.f32 %v963_v32, %v442_v10  ;;  %v405_v25 = vmul.f32 %v594_v60, %v906_v20  ;;  %v348_v62 = vadd.f32 1e-05, %v316_v57  ;;  %v285_v3 = vpop.xlane.xlu1 %284 }
 0x176   :  { %v482_v11 = vadd.f32 %v963_v32, %v443_v58  ;;  %v406_v63 = vmul.f32 %v596_v18, %v913_v13  ;;  %605 = vrsqrt.f32 %v347_v37  ;;  %v317_v1 = vmul.f32 0.0078125, %v285_v3 }
 0x177   :  { %513 = vst [vmem:[#allocation5 + $0xa8] sm:$0xff] %v481_v53  ;;  %v444_v2 = vmul.f32 %v957_v0, %v405_v25  ;;  %607 = vrsqrt.f32 %v348_v62 }
 0x178   :  { %v598_v27 = vpop.eup %597  ;;  %514 = vst [vmem:[#allocation5 + $0xb0] sm:$0xff] %v482_v11  ;;  %v445_v6 = vmul.f32 %v957_v0, %v406_v63  ;;  %v349_v12 = vadd.f32 1e-05, %v317_v1 }
 0x179   :  { %v600_v7 = vpop.eup %599  ;;  %v483_v20 = vadd.f32 %v963_v32, %v444_v2  ;;  %v407_v44 = vmul.f32 %v598_v27, %v916_v22 }
 0x17a   :  { %v484_v33 = vadd.f32 %v963_v32, %v445_v6  ;;  %v408_v13 = vmul.f32 %v600_v7, %v923_v15  ;;  %609 = vrsqrt.f32 %v349_v12 }
 0x17b   :  { %515 = vst [vmem:[#allocation5 + $0xb8] sm:$0xff] %v483_v20  ;;  %v446_v4 = vmul.f32 %v957_v0, %v407_v44 }
 0x17c   :  { %v602_v61 = vpop.eup %601  ;;  %516 = vst [vmem:[#allocation5 + $0xc0] sm:$0xff] %v484_v33  ;;  %v447_v34 = vmul.f32 %v957_v0, %v408_v13 }
 0x17d   :  { %v604_v29 = vpop.eup %603  ;;  %v485_v51 = vadd.f32 %v963_v32, %v446_v4  ;;  %v409_v38 = vmul.f32 %v602_v61, %v926_v24 }
 0x17e   :  { %v486_v35 = vadd.f32 %v963_v32, %v447_v34  ;;  %v410_v22 = vmul.f32 %v604_v29, %v933_v17 }
 0x17f   :  { %517 = vst [vmem:[#allocation5 + $0xc8] sm:$0xff] %v485_v51  ;;  %v448_v15 = vmul.f32 %v957_v0, %v409_v38 }
 0x180   :  { %v606_v39 = vpop.eup %605  ;;  %518 = vst [vmem:[#allocation5 + $0xd0] sm:$0xff] %v486_v35  ;;  %v449_v40 = vmul.f32 %v957_v0, %v410_v22 }
 0x181   :  { %v608_v30 = vpop.eup %607  ;;  %v487_v14 = vadd.f32 %v963_v32, %v448_v15  ;;  %v411_v41 = vmul.f32 %v606_v39, %v936_v26 }
 0x182   :  { %v488_v36 = vadd.f32 %v963_v32, %v449_v40  ;;  %v412_v24 = vmul.f32 %v608_v30, %v943_v19 }
 0x183   :  { %519 = vst [vmem:[#allocation5 + $0xd8] sm:$0xff] %v487_v14  ;;  %v450_v42 = vmul.f32 %v957_v0, %v411_v41 }
 0x184   :  { %v610_v17 = vpop.eup %609  ;;  %520 = vst [vmem:[#allocation5 + $0xe0] sm:$0xff] %v488_v36  ;;  %v451_v21 = vmul.f32 %v957_v0, %v412_v24 }
 0x185   :  { %v489_v5 = vadd.f32 %v963_v32, %v450_v42  ;;  %v413_v52 = vmul.f32 %v610_v17, %v946_v28 }
 0x186   :  { %v490_v8 = vadd.f32 %v963_v32, %v451_v21 }
 0x187   :  { %521 = vst [vmem:[#allocation5 + $0xe8] sm:$0xff] %v489_v5  ;;  %v452_v26 = vmul.f32 %v957_v0, %v413_v52 }
 0x188   :  { %522 = vst [vmem:[#allocation5 + $0xf0] sm:$0xff] %v490_v8 }
 0x189   :  { %v491_v19 = vadd.f32 %v963_v32, %v452_v26 }
 0x18b   :  { %523 = vst [vmem:[#allocation5 + $0xf8] sm:$0xff] %v491_v19 }
 0x18c   :  { %644 = shalt.err (!%p641_p12)
}
 0x18d   :  { %s645_s5 = scalar_lea.hbm %s1078_s3, 4096 }
 0x18e   :  { %p646_p13 = scmp.ne.s32.totalorder %s1078_s3, %s645_s5  ;;  %p649_p0 = scmp.lt.u32.totalorder %s645_s5, %s1078_s3 }
 0x190   :  { %p651_p1 = pnand %p649_p0, %p646_p13 }
 0x192   :  { %654 = shalt.err (!%p651_p1)
}
 0x193   :  { %535 = dma.vmem_to_hbm [thread:$0]  %s530_s2, 4096, %s1078_s3, [#allocation4], %s660_s22, %s660_s22, %s661_s23  }
 0x194   :  { %657 = dma.done.wait [#allocation4], 4096  }
 0x195   :  { %658 = vsyncadd [#allocation4], 4294963200 }
 0x196   :  { %539 = vsyncpa [#allocation3], 1 }
 0x197   :  { %540 = vsyncpa [#allocation4], 1 }

</bundles_post_ra>
